<compile_context>
chip_gen: v6e
topology: v6e:2x2x1
jax: 0.10.0
libtpu: 0.0.40
codegen_flags: <defaults>
</compile_context>

<pallas_src>
import jax
import jax.numpy as jnp
from jax.experimental import pallas as pl
from jax.experimental.pallas import tpu as pltpu

EPS = 1e-5  # PyTorch nn.LayerNorm default


def _round_up(n, m):
    return ((n + m - 1) // m) * m


def prenorm_kernel(x_ref, gamma_ref, beta_ref, w_ref, bias_ref, o_ref, y_ref):
    """Computes one (tm, tn) output tile.

    Grid = (row_tiles, col_tiles), column axis innermost and sequential.
    x_ref:     (tm, D)   activation row tile (DMA'd once per row tile)
    gamma/beta:(1, D)    LayerNorm affine parameters
    w_ref:     (D, tn)   Linear weight column tile
    bias_ref:  (1, tn)   Linear bias column tile
    o_ref:     (tm, tn)  output tile
    y_ref:     (tm, D)   VMEM scratch caching LN(x)*gamma+beta in w's dtype
    """
    j = pl.program_id(1)

    @pl.when(j == 0)
    def _():
        x = x_ref[...].astype(jnp.float32)
        inv_d = 1.0 / x.shape[-1]
        # Two-pass LayerNorm statistics (biased variance, like torch).
        mean = jnp.sum(x, axis=-1, keepdims=True) * inv_d
        xc = x - mean
        var = jnp.sum(xc * xc, axis=-1, keepdims=True) * inv_d
        xhat = xc * jax.lax.rsqrt(var + EPS)
        y = (xhat * gamma_ref[...].astype(jnp.float32)
             + beta_ref[...].astype(jnp.float32))
        y_ref[...] = y.astype(y_ref.dtype)

    # fn = Linear(D, D): native-dtype operands on the MXU, f32 accumulation.
    out = jnp.dot(y_ref[...], w_ref[...], preferred_element_type=jnp.float32)
    out = out + bias_ref[...].astype(jnp.float32)
    o_ref[...] = out.astype(o_ref.dtype)


def _pick_tn(d, tile_cols):
    """Largest 128-aligned divisor of d that is <= tile_cols (else full d)."""
    if d <= tile_cols:
        return d
    t = (tile_cols // 128) * 128
    while t >= 128:
        if d % t == 0:
            return t
        t -= 128
    return d


def _vmem_need_bytes(tm, tn, d, x_bytes, w_bytes, o_bytes):
    x_blk = tm * d * x_bytes          # activation row tile
    w_blk = d * tn * w_bytes          # weight column tile
    o_blk = tm * tn * o_bytes         # output tile
    params = (2 * d + d + tn) * 4     # gamma, beta, bias (generous, f32)
    y_scr = tm * d * w_bytes          # cached normalized activations
    ln_tmp = 4 * tm * d * 4           # f32 temporaries while computing LN
    # double-buffered pipelined operands + scratch + temporaries
    return 2 * (x_blk + w_blk + o_blk + params) + y_scr + ln_tmp


def pre_norm(x, gamma, beta, w, bias, *, tile_rows=512, tile_cols=512):
    """x: (B, S, D) -> (B, S, D).  LayerNorm(D) followed by Linear(D, D).

    Works for f32 or bf16 x/w (LN statistics are always computed in f32;
    bf16 x/w halves HBM traffic and doubles MXU throughput in production).
    """
    B, S, D = x.shape
    N = B * S
    x2 = x.reshape(N, D)
    gamma2 = gamma.reshape(1, D)
    beta2 = beta.reshape(1, D)
    bias2 = bias.reshape(1, D)

    out_dtype = x.dtype
    x_bytes = jnp.dtype(x.dtype).itemsize
    w_bytes = jnp.dtype(w.dtype).itemsize
    o_bytes = jnp.dtype(out_dtype).itemsize

    # ---- column tile: lane-dense (multiple of 128) divisor of D ----
    tn = _pick_tn(D, tile_cols)
    n_col = pl.cdiv(D, tn)

    # ---- row tile ----
    if N <= 8:
        tm = N  # block dim equals the full array dim -> always legal
    else:
        # In the small-D (HBM-bound) regime grow the tile so each x block is
        # ~1 MiB; cap at 1024 rows.
        tm_target = max(tile_rows,
                        min(1024, _round_up(max(8, (1 << 20) // (D * x_bytes)), 8)))
        tm = min(tm_target, _round_up(N, 8))
        # Keep n_row >= 2 so both v7x TensorCores get row tiles.
        tm = min(tm, _round_up(pl.cdiv(N, 2), 8))
        tm = max(8, (tm // 8) * 8)
        # Shrink until the blocks fit a conservative per-core VMEM budget.
        while tm > 8 and _vmem_need_bytes(tm, tn, D, x_bytes, w_bytes,
                                          o_bytes) > (40 << 20):
            tm = max(8, ((tm // 2) // 8) * 8)

    n_row = pl.cdiv(N, tm)

    need = _vmem_need_bytes(tm, tn, D, x_bytes, w_bytes, o_bytes)
    # Explicit budget derived from the blocks, capped well below v7x's
    # 64 MiB physical VMEM per TensorCore (leaves compiler headroom).
    vmem_limit = max(32 << 20, min(int(need * 1.5) + (4 << 20), 48 << 20))

    call = pl.pallas_call(
        prenorm_kernel,
        out_shape=jax.ShapeDtypeStruct((N, D), out_dtype),
        grid_spec=pltpu.PrefetchScalarGridSpec(
            num_scalar_prefetch=0,
            grid=(n_row, n_col),
            in_specs=[
                pl.BlockSpec((tm, D), lambda i, j: (i, 0)),   # x row tile
                pl.BlockSpec((1, D), lambda i, j: (0, 0)),    # gamma
                pl.BlockSpec((1, D), lambda i, j: (0, 0)),    # beta
                pl.BlockSpec((D, tn), lambda i, j: (0, j)),   # W column tile
                pl.BlockSpec((1, tn), lambda i, j: (0, j)),   # bias column tile
            ],
            out_specs=pl.BlockSpec((tm, tn), lambda i, j: (i, j)),
            scratch_shapes=[pltpu.VMEM((tm, D), w.dtype)],    # cached y=LN(x)
        ),
        compiler_params=pltpu.CompilerParams(
            # Rows shard across TensorCores; the column axis carries the y
            # scratch across tiles, so it must iterate sequentially.
            dimension_semantics=("parallel", "arbitrary"),
            vmem_limit_bytes=vmem_limit,
        ),
    )
    out2 = call(x2, gamma2, beta2, w, bias2)
    return out2.reshape(B, S, D)


def reference(x, gamma, beta, w, bias):
    xf = x.astype(jnp.float32)
    mean = jnp.mean(xf, axis=-1, keepdims=True)
    var = jnp.mean((xf - mean) ** 2, axis=-1, keepdims=True)
    xhat = (xf - mean) / jnp.sqrt(var + EPS)
    y = xhat * gamma + beta
    return (y @ w + bias).astype(x.dtype)


if __name__ == "__main__":
    # Small but lane-dense test shape: D is a multiple of 128 so the output
    # last dim maps densely onto vreg lanes (no masked partial stores).
    # TODO(synk): the PyTorch module's `fn` is generic; it is instantiated as
    # Linear(D, D) here (the common use in MDCA_Encoder).
    B, S, D = 2, 8, 128
    key = jax.random.PRNGKey(0)
    kx, kg, kb, kw, kbi = jax.random.split(key, 5)

    x = jax.random.normal(kx, (B, S, D), dtype=jnp.float32)
    # LayerNorm params perturbed slightly so the affine path is exercised.
    gamma = 1.0 + 0.01 * jax.random.normal(kg, (D,), dtype=jnp.float32)
    beta = 0.01 * jax.random.normal(kb, (D,), dtype=jnp.float32)
    w = jax.random.normal(kw, (D, D), dtype=jnp.float32) * (1.0 / jnp.sqrt(D))
    bias = 0.01 * jax.random.normal(kbi, (D,), dtype=jnp.float32)

    out = pre_norm(x, gamma, beta, w, bias)
    out = jax.block_until_ready(out)

    ref = reference(x, gamma, beta, w, bias)
    assert out.shape == (B, S, D)
    assert jnp.allclose(out, ref, atol=1e-3, rtol=1e-3), "mismatch vs reference"

    print("KERNEL_OK")
</pallas_src>

<mosaic_0001>
module attributes {stable_mosaic.version = 11 : i64} {
  func.func @prenorm_kernel(%arg0: i32, %arg1: i32, %arg2: memref<8x128xf32, #tpu.memory_space<vmem>>, %arg3: memref<1x128xf32, #tpu.memory_space<vmem>>, %arg4: memref<1x128xf32, #tpu.memory_space<vmem>>, %arg5: memref<128x128xf32, #tpu.memory_space<vmem>>, %arg6: memref<1x128xf32, #tpu.memory_space<vmem>>, %arg7: memref<8x128xf32, #tpu.memory_space<vmem>>, %arg8: memref<8x128xf32, #tpu.memory_space<vmem>>) attributes {dimension_semantics = [#tpu.dimension_semantics<parallel>, #tpu.dimension_semantics<arbitrary>], iteration_bounds = array<i64: 2, 1>, scalar_prefetch = 0 : i64, scratch_operands = 1 : i64, tpu.core_type = #tpu.core_type<tc>, window_params = [{transform_indices = @transform_0, window_bounds = array<i64: 8, 128>}, {pipeline_mode = #tpu.pipeline_mode<synchronous>, transform_indices = @transform_1, window_bounds = array<i64: 1, 128>}, {pipeline_mode = #tpu.pipeline_mode<synchronous>, transform_indices = @transform_2, window_bounds = array<i64: 1, 128>}, {transform_indices = @transform_3, window_bounds = array<i64: 128, 128>}, {transform_indices = @transform_4, window_bounds = array<i64: 1, 128>}, {transform_indices = @transform_5, window_bounds = array<i64: 8, 128>}]} {
    %c0_i32 = arith.constant 0 : i32
    %0 = arith.cmpi eq, %arg1, %c0_i32 : i32
    %1 = arith.extui %0 : i1 to i32
    %c0_i32_0 = arith.constant 0 : i32
    %2 = arith.cmpi ne, %1, %c0_i32_0 : i32
    scf.if %2 {
      %c0_8 = arith.constant 0 : index
      %c0_9 = arith.constant 0 : index
      %10 = vector.load %arg2[%c0_8, %c0_9] : memref<8x128xf32, #tpu.memory_space<vmem>>, vector<8x128xf32>
      %cst_10 = arith.constant dense<0.000000e+00> : vector<8xf32>
      %11 = vector.multi_reduction <add>, %10, %cst_10 [1] : vector<8x128xf32> to vector<8xf32>
      %12 = vector.shape_cast %11 : vector<8xf32> to vector<8x1xf32>
      %cst_11 = arith.constant 7.812500e-03 : f32
      %13 = vector.broadcast %cst_11 : f32 to vector<8x1xf32>
      %14 = arith.mulf %12, %13 : vector<8x1xf32>
      %15 = vector.broadcast %14 : vector<8x1xf32> to vector<8x128xf32>
      %16 = arith.subf %10, %15 : vector<8x128xf32>
      %17 = arith.mulf %16, %16 : vector<8x128xf32>
      %cst_12 = arith.constant dense<0.000000e+00> : vector<8xf32>
      %18 = vector.multi_reduction <add>, %17, %cst_12 [1] : vector<8x128xf32> to vector<8xf32>
      %19 = vector.shape_cast %18 : vector<8xf32> to vector<8x1xf32>
      %cst_13 = arith.constant 7.812500e-03 : f32
      %20 = vector.broadcast %cst_13 : f32 to vector<8x1xf32>
      %21 = arith.mulf %19, %20 : vector<8x1xf32>
      %cst_14 = arith.constant 9.99999974E-6 : f32
      %22 = vector.broadcast %cst_14 : f32 to vector<8x1xf32>
      %23 = arith.addf %21, %22 : vector<8x1xf32>
      %24 = math.rsqrt %23 : vector<8x1xf32>
      %25 = vector.broadcast %24 : vector<8x1xf32> to vector<8x128xf32>
      %26 = arith.mulf %16, %25 : vector<8x128xf32>
      %c0_15 = arith.constant 0 : index
      %c0_16 = arith.constant 0 : index
      %27 = vector.load %arg3[%c0_15, %c0_16] : memref<1x128xf32, #tpu.memory_space<vmem>>, vector<1x128xf32>
      %28 = vector.broadcast %27 : vector<1x128xf32> to vector<8x128xf32>
      %29 = arith.mulf %26, %28 : vector<8x128xf32>
      %c0_17 = arith.constant 0 : index
      %c0_18 = arith.constant 0 : index
      %30 = vector.load %arg4[%c0_17, %c0_18] : memref<1x128xf32, #tpu.memory_space<vmem>>, vector<1x128xf32>
      %31 = vector.broadcast %30 : vector<1x128xf32> to vector<8x128xf32>
      %32 = arith.addf %29, %31 : vector<8x128xf32>
      %c0_19 = arith.constant 0 : index
      %c0_20 = arith.constant 0 : index
      %33 = vector.load %arg8[%c0_19, %c0_20] : memref<8x128xf32, #tpu.memory_space<vmem>>, vector<8x128xf32>
      tpu.vector_store %arg8[%c0_19, %c0_20], %32 {strides = array<i32>} : memref<8x128xf32, #tpu.memory_space<vmem>>, vector<8x128xf32>,
    } else {
    }
    %c0 = arith.constant 0 : index
    %c0_1 = arith.constant 0 : index
    %3 = vector.load %arg8[%c0, %c0_1] : memref<8x128xf32, #tpu.memory_space<vmem>>, vector<8x128xf32>
    %c0_2 = arith.constant 0 : index
    %c0_3 = arith.constant 0 : index
    %4 = vector.load %arg5[%c0_2, %c0_3] : memref<128x128xf32, #tpu.memory_space<vmem>>, vector<128x128xf32>
    %cst = arith.constant dense<0.000000e+00> : vector<8x128xf32>
    %5 = tpu.matmul %3, %4, %cst {dimension_numbers = #tpu.dot_dimension_numbers<[1], [0], [0], [1], [0, 0, 1, 1], [], []>} : vector<8x128xf32>, vector<128x128xf32>, vector<8x128xf32> -> vector<8x128xf32>
    %c0_4 = arith.constant 0 : index
    %c0_5 = arith.constant 0 : index
    %6 = vector.load %arg6[%c0_4, %c0_5] : memref<1x128xf32, #tpu.memory_space<vmem>>, vector<1x128xf32>
    %7 = vector.broadcast %6 : vector<1x128xf32> to vector<8x128xf32>
    %8 = arith.addf %5, %7 : vector<8x128xf32>
    %c0_6 = arith.constant 0 : index
    %c0_7 = arith.constant 0 : index
    %9 = vector.load %arg7[%c0_6, %c0_7] : memref<8x128xf32, #tpu.memory_space<vmem>>, vector<8x128xf32>
    tpu.vector_store %arg7[%c0_6, %c0_7], %8 {strides = array<i32>} : memref<8x128xf32, #tpu.memory_space<vmem>>, vector<8x128xf32>,
    return
  }
  func.func @transform_0(%arg0: i32, %arg1: i32) -> (i32, i32) {
    %c0_i32 = arith.constant 0 : i32
    %c0_i32_0 = arith.constant 0 : i32
    return %arg0, %c0_i32 : i32, i32
  }
  func.func @transform_1(%arg0: i32, %arg1: i32) -> (i32, i32) {
    %c0_i32 = arith.constant 0 : i32
    %c0_i32_0 = arith.constant 0 : i32
    %c0_i32_1 = arith.constant 0 : i32
    return %c0_i32, %c0_i32_0 : i32, i32
  }
  func.func @transform_2(%arg0: i32, %arg1: i32) -> (i32, i32) {
    %c0_i32 = arith.constant 0 : i32
    %c0_i32_0 = arith.constant 0 : i32
    %c0_i32_1 = arith.constant 0 : i32
    return %c0_i32, %c0_i32_0 : i32, i32
  }
  func.func @transform_3(%arg0: i32, %arg1: i32) -> (i32, i32) {
    %c0_i32 = arith.constant 0 : i32
    %c0_i32_0 = arith.constant 0 : i32
    return %c0_i32, %arg1 : i32, i32
  }
  func.func @transform_4(%arg0: i32, %arg1: i32) -> (i32, i32) {
    %c0_i32 = arith.constant 0 : i32
    %c0_i32_0 = arith.constant 0 : i32
    return %c0_i32, %arg1 : i32, i32
  }
  func.func @transform_5(%arg0: i32, %arg1: i32) -> (i32, i32) {
    %c0_i32 = arith.constant 0 : i32
    return %arg0, %arg1 : i32, i32
  }
}

</mosaic_0001>

<bundles_post_ra>
// kernel: tpu_custom_call.1
= control target key start
LH: loop header
LB: loop body
LE: loop exit
PB: predicated region body
PF: predicated region fallthrough
CT: control target
= control target key end

     0   :  { %s1049_s0 = inlined_call_operand.hbm [shape: f32[16,128], index: 0, kind: input, shape index: {}]   ;;  %s1050_s1 = inlined_call_operand.vmem [shape: f32[1,128], index: 1, kind: input, shape index: {}]   ;;  %s1051_s2 = inlined_call_operand.vmem [shape: f32[1,128], index: 2, kind: input, shape index: {}]   ;;  %s1052_s3 = inlined_call_operand.hbm [shape: f32[128,128], index: 3, kind: input, shape index: {}]   ;;  %s1053_s4 = inlined_call_operand.vmem [shape: f32[1,128], index: 4, kind: input, shape index: {}]   ;;  %s1054_s5 = inlined_call_operand.hbm [shape: f32[16,128], index: 5, kind: output, shape index: {}]  }
   0x1   :  { %1057 = sst [smem:[#allocation13_spill]] %s1052_s3 }
   0x2   :  { %10 = vsyncpa [#allocation4], 0 }
   0x3   :  { %12 = vsyncpa [#allocation4 + $0x1], 0 }
   0x4   :  { %13 = vsyncpa [#allocation7], 0 }
   0x5   :  { %14 = vsyncpa [#allocation5], 0 }
   0x6   :  { %16 = vsyncpa [#allocation5 + $0x1], 0  ;;  %s863_s18 = smov 0   ;;  %s865_s19 = smov 0  }
   0x7   :  { %s867_s20 = smov 0   ;;  %s869_s21 = smov 0  }
   0x8   :  { %s871_s22 = smov 0   ;;  %s873_s23 = smov 0  }
   0x9 LB: > { %s536_s24 = sadd.s32 4294967295, %s824_s23   ;;  %s537_s25 = sadd.s32 4294967294, %s824_s23   ;;  %s824_s23 = sphi %s873_s23, %s22_s23   ;;  %s820_s22 = sphi %s871_s22, %s1077_s22   ;;  %s816_s21 = sphi %s869_s21, %s1076_s21   ;;  %s812_s20 = sphi %s867_s20, %s1075_s20   ;;  %s808_s19 = sphi %s865_s19, %s1074_s19   ;;  %s804_s18 = sphi %s863_s18, %s1073_s18  }
   0xa   : > { %p54_p0 = scmp.ne.s32.totalorder %s808_s19, %s804_s18  ;;  %p897_p1 = scmp.eq.s32.totalorder %s536_s24, 0 }
   0xb   : > { %p901_p2 = scmp.eq.s32.totalorder %s536_s24, 1  ;;  %p180_p3 = scmp.eq.s32.totalorder %s537_s25, 1 }
   0xc   : > { %p907_p4 = por %p897_p1, %p54_p0  ;;  %p538_p5 = scmp.ge.s32.totalorder %s824_s23, 1 }
   0xd   : > { %p912_p6 = por %p180_p3, %p54_p0  ;;  %p187_p7 = scmp.lt.s32.totalorder %s824_s23, 3 }
   0xe   : > { %s1060_s28 = scalar_select %p907_p4, 1, 0 }
   0xf   : > { %s1061_s29 = scalar_select %p912_p6, 1, 0 }
  0x10   : > { %p917_p8 = pnand %p538_p5, %p187_p7  ;;  %s826_s6 = smov [#allocation6]  }
  0x11   : > { %s207_s7 = sshll.u32 %s826_s6, 4  ;;  %s34_s9 = sadd.s32 1, %s820_s22  ;;  %s208_s7 = int_to_ptr.vmem [resolvable:$true] %s207_s7 }
  0x12   : > { %p615_p9 = pneg %p917_p8  ;;  %s697_s10 = scalar_lea.vmem %s208_s7, 2048 }
  0x13   : > { %p698_p13 = scmp.ne.s32.totalorder %s208_s7, %s697_s10  ;;  %p705_p5 = scmp.lt.s32.totalorder %s208_s7, %s208_s7 }
  0x14   : > { %p926_p11 = pnand %p615_p9, %p897_p1  ;;  %p706_p7 = scmp.lt.s32.totalorder %s697_s10, %s697_s10 }
  0x16   : > { %p688_p12 = pneg %p926_p11  ;;  %p707_p6 = por %p706_p7, %p705_p5 }
  0x18   : > { %p700_p0 = pnand %p698_p13, %p688_p12 }
  0x1a   : > { %p701_p3 = pneg %p700_p0 }
  0x1c   : > { %p708_p4 = pnand %p707_p6, %p701_p3 }
  0x1e   : > { %711 = shalt.err (!%p708_p4)
}
  0x1f   : > { %s827_s11 = smov 128   ;;  %s828_s12 = smov 8  }
  0x20   : > { %s1064_s3 = sld [smem:[#allocation13_spill]]  ;;  %p36_p6 = scmp.ge.s32.totalorder %s34_s9, 2 }
  0x21   : > { %s41_s15 = sadd.s32 1, %s812_s20  ;;  %p48_p4 = scmp.ne.s32.totalorder %s812_s20, %s808_s19 }
  0x22   : > { %p49_p9 = scmp.eq.s32.totalorder %s824_s23, 0  ;;  %s1079_s9 = smov (%p36_p6, %s34_s9), 0 }
  0x23   : > { %1065 = sst [smem:[#allocation12_spill]] %s1079_s9  ;;  %p950_p13 = por %p901_p2, %p48_p4 }
  0x24   : > { %p944_p12 = por %p49_p9, %p48_p4  ;;  %s38_s24 = ssub.s32 %s820_s22, %s1079_s9 }
  0x25   : > { %p628_p0 = scmp.lt.s32.totalorder %s824_s23, 2  ;;  %s227_s25 = sand.u32 1, %s812_s20  }
  0x26   : > { %618 = dma.hbm_to_vmem [thread:$0]  (!%p926_p11), %s1064_s3, 2048, %s208_s7, [#allocation7], %s827_s11, %s827_s11, %s828_s12  }
  0x27   : > { %p39_p11 = scmp.eq.s32.totalorder %s38_s24, 0  ;;  %s542_s6 = sshll.u32 %s227_s25, 3 }
  0x28   : > { %s543_s8 = sshll.u32 %s820_s22, 7  ;;  %s231_s13 = scalar_lea.vmem [#allocation3], %s542_s6 }
  0x29   : > { %s959_s7 = scalar_select %p39_p11, %s812_s20, %s41_s15  }
  0x2a   : > { %s236_s12 = scalar_lea.hbm %s1049_s0, %s543_s8  ;;  %s238_s14 = sshll.u32 %s231_s13, 4  ;;  %s239_s14 = int_to_ptr.vmem [resolvable:$true] %s238_s14 }
  0x2b   : > { %p967_p2 = pnand %p628_p0, %p944_p12  ;;  %s228_s3 = scalar_lea.sflag [#allocation4], %s227_s25 }
  0x2c   : > { %s725_s24 = scalar_lea.vmem %s239_s14, 128  ;;  %s829_s15 = smov [#allocation3]  }
  0x2d   : > { %p714_p3 = pneg %p967_p2  ;;  %p726_p5 = scmp.ne.s32.totalorder %s239_s14, %s725_s24 }
  0x2e   : > { %s730_s9 = sshll.u32 %s829_s15, 4  ;;  %s731_s9 = int_to_ptr.vmem [resolvable:$false] %s730_s9 }
  0x2f   : > { %p728_p7 = pnand %p726_p5, %p714_p3  ;;  %s732_s8 = scalar_lea.vmem %s731_s9, 256 }
  0x30   : > { %p733_p4 = scmp.lt.s32.totalorder %s239_s14, %s731_s9  ;;  %p734_p9 = scmp.lt.s32.totalorder %s732_s8, %s725_s24 }
  0x31   : > { %p729_p6 = pneg %p728_p7 }
  0x32   : > { %p735_p11 = por %p734_p9, %p733_p4 }
  0x34   : > { %p736_p10 = pnand %p735_p11, %p729_p6 }
  0x36   : > { %739 = shalt.err (!%p736_p10)
}
  0x37   : > { %622 = dma.hbm_to_vmem [thread:$0]  (!%p967_p2), %s236_s12, 128, %s239_s14, %s228_s3  }
  0x38   : > { %247 = sbr.rel (%p917_p8) target bundleno = 579 (0x243), region = 40  ;;  %s978_s16 = sand.u32 (!%p917_p8), 1, %s808_s19  }
  0x39   : > { %s545_s25 = sshll.u32 (!%p917_p8), %s978_s16, 3  ;;  %s250_s6 = scalar_lea.sflag (!%p917_p8), [#allocation4], %s978_s16 }
  0x3a   : > { %s253_s9 = scalar_lea.vmem (!%p917_p8), [#allocation3], %s545_s25  ;;  %p1069_p12 = scmp.ne.s32.totalorder (!%p917_p8), %s1060_s28, 0 }
  0x3d   : > { %791 = dma.done.wait (%p1069_p12), %s250_s6, 128  }
  0x3e   : > { %793 = vsyncadd (%p1069_p12), %s250_s6, 4294967168 }
  0x3f   : > { %795 = dma.done.wait (%p897_p1), [#allocation7], 2048  }
  0x40   : > { %797 = vsyncadd (%p897_p1), [#allocation7], 4294965248  ;;  %v294_v0 = vld [vmem:[%s253_s9] sm:$0xff]  ;;  %v830_v2 = vmov 0.0   ;;  %v337_v4 = vld [vmem:[#allocation6 + $0x68] sm:$0xff]  ;;  %vm831_vm0 = vmmov 0  }
  0x41   : > { %295 = vadd.xlane.f32.xlu0 %v294_v0  ;;  %v339_v1 = vld [vmem:[#allocation6 + $0x78] sm:$0xff]  ;;  %572 = vmatprep.subr.mxu0 %v830_v2  ;;  %v338_v3 = vld [vmem:[#allocation6 + $0x70] sm:$0xff]  ;;  %v336_v5 = vld [vmem:[#allocation6 + $0x60] sm:$0xff]  ;;  %s552_s12 = sshll.u32 %s816_s21, 7  ;;  %s286_s13 = scalar_lea.vmem [#allocation8], %s545_s25 }
  0x42   : > { %573 = vmatpush3.msra.mxu0 %v339_v1  ;;  %v335_v10 = vld [vmem:[#allocation6 + $0x58] sm:$0xff]  ;;  %v334_v11 = vld [vmem:[#allocation6 + $0x50] sm:$0xff]  ;;  %v333_v12 = vld [vmem:[#allocation6 + $0x48] sm:$0xff]  ;;  %604 = vmatprep.mubr.msk.f32.mxu0 %vm831_vm0, %v830_v2  ;;  %s433_s14 = sshll.u32 %s286_s13, 4  ;;  %s1007_s15 = scalar_lea.hbm %s1054_s5, %s552_s12  ;;  %s434_s14 = int_to_ptr.vmem [resolvable:$true] %s433_s14 }
  0x43   : > { %574 = vmatprep.subr.mxu0 %v830_v2  ;;  %v332_v13 = vld [vmem:[#allocation6 + $0x40] sm:$0xff]  ;;  %v331_v14 = vld [vmem:[#allocation6 + $0x38] sm:$0xff]  ;;  %v330_v15 = vld [vmem:[#allocation6 + $0x30] sm:$0xff]  ;;  %s419_s8 = scalar_lea.sflag [#allocation5], %s978_s16  ;;  %s740_s6 = scalar_lea.vmem %s434_s14, 128 }
  0x44   : > { %575 = vmatpush3.msra.mxu0 %v338_v3  ;;  %v329_v16 = vld [vmem:[#allocation6 + $0x28] sm:$0xff]  ;;  %v328_v17 = vld [vmem:[#allocation6 + $0x20] sm:$0xff]  ;;  %v327_v18 = vld [vmem:[#allocation6 + $0x18] sm:$0xff]  ;;  %p741_p1 = scmp.ne.s32.totalorder %s434_s14, %s740_s6  ;;  %s832_s21 = smov [#allocation8]  }
  0x45   : > { %576 = vmatprep.subr.mxu0 %v830_v2  ;;  %v326_v19 = vld [vmem:[#allocation6 + $0x10] sm:$0xff]  ;;  %v325_v20 = vld [vmem:[#allocation6 + $0x8] sm:$0xff]  ;;  %v324_v21 = vld [vmem:[#allocation6] sm:$0xff]  ;;  %s744_s9 = sshll.u32 %s832_s21, 4  ;;  %s745_s9 = int_to_ptr.vmem [resolvable:$false] %s744_s9 }
  0x46   : > { %577 = vmatpush3.msra.mxu0 %v337_v4  ;;  %v548_v26 = vld [vmem:[%s1050_s1] ss:$0 sm:$0xff]  ;;  %p742_p8 = pnand %p741_p1, %p950_p13  ;;  %s746_s25 = scalar_lea.vmem %s745_s9, 256 }
  0x47   : > { %578 = vmatprep.subr.mxu0 %v830_v2  ;;  %v549_v28 = vld [vmem:[%s1051_s2] ss:$0 sm:$0xff]  ;;  %p747_p0 = scmp.lt.s32.totalorder %s434_s14, %s745_s9  ;;  %p748_p2 = scmp.lt.s32.totalorder %s746_s25, %s740_s6 }
  0x48   : > { %579 = vmatpush3.msra.mxu0 %v336_v5  ;;  %v550_v31 = vld [vmem:[%s1053_s4] ss:$0 sm:$0xff]  ;;  %p743_p10 = pneg %p742_p8 }
  0x49   : > { %580 = vmatprep.subr.mxu0 %v830_v2  ;;  %p749_p3 = por %p748_p2, %p747_p0 }
  0x4a   : > { %581 = vmatpush3.msra.mxu0 %v335_v10 }
  0x4b   : > { %582 = vmatprep.subr.mxu0 %v830_v2  ;;  %p750_p5 = pnand %p749_p3, %p743_p10 }
  0x4c   : > { %583 = vmatpush3.msra.mxu0 %v334_v11 }
  0x4d   : > { %584 = vmatprep.subr.mxu0 %v830_v2 }
  0x4e   : > { %585 = vmatpush3.msra.mxu0 %v333_v12 }
  0x4f   : > { %586 = vmatprep.subr.mxu0 %v830_v2 }
  0x50   : > { %587 = vmatpush3.msra.mxu0 %v332_v13 }
  0x51   : > { %588 = vmatprep.subr.mxu0 %v830_v2 }
  0x52   : > { %589 = vmatpush3.msra.mxu0 %v331_v14 }
  0x53   : > { %590 = vmatprep.subr.mxu0 %v830_v2 }
  0x54   : > { %591 = vmatpush3.msra.mxu0 %v330_v15 }
  0x55   : > { %592 = vmatprep.subr.mxu0 %v830_v2 }
  0x56   : > { %593 = vmatpush3.msra.mxu0 %v329_v16 }
  0x57   : > { %594 = vmatprep.subr.mxu0 %v830_v2 }
  0x58   : > { %595 = vmatpush3.msra.mxu0 %v328_v17 }
  0x59   : > { %596 = vmatprep.subr.mxu0 %v830_v2 }
  0x5a   : > { %597 = vmatpush3.msra.mxu0 %v327_v18 }
  0x5b   : > { %598 = vmatprep.subr.mxu0 %v830_v2 }
  0x5c   : > { %599 = vmatpush3.msra.mxu0 %v326_v19 }
  0x5d   : > { %600 = vmatprep.subr.mxu0 %v830_v2 }
  0x5e   : > { %601 = vmatpush3.msra.mxu0 %v325_v20 }
  0x5f   : > { %602 = vmatprep.subr.mxu0 %v830_v2 }
  0x60   : > { %603 = vmatpush3.msra.mxu0 %v324_v21 }
  0xca   : > { %v296_v6 = vpop.xlane.xlu0 %295 }
  0xcb   : > { %v297_v7 = vmul.f32 0.0078125, %v296_v6 }
  0xcd   : > { %v298_v8 = vsub.f32 %v294_v0, %v297_v7 }
  0xcf   : > { %v299_v9 = vmul.f32 %v298_v8, %v298_v8 }
  0xd1   : > { %300 = vadd.xlane.f32.xlu0 %v299_v9 }
 0x15a   : > { %v301_v22 = vpop.xlane.xlu0 %300 }
 0x15b   : > { %v302_v23 = vmul.f32 0.0078125, %v301_v22 }
 0x15d   : > { %v303_v24 = vadd.f32 1e-05, %v302_v23 }
 0x15f   : > { %684 = vrsqrt.f32 %v303_v24 }
 0x16c   : > { %v685_v25 = vpop.eup %684 }
 0x16d   : > { %v305_v27 = vmul.f32 %v685_v25, %v298_v8 }
 0x16f   : > { %v313_v29 = vmul.f32 %v548_v26, %v305_v27 }
 0x171   : > { %v321_v30 = vadd.f32 %v549_v28, %v313_v29 }
 0x173   : > { %605 = vmatmul.mubr.f32.vlgmr.msra.gmra.mxu0 %v321_v30 }
 0x233   : > { %v413_v32 = vpop.f32.mrf.mxu0 }
 0x234   : > { %v414_v33 = vadd.f32 %v550_v31, %v413_v32 }
 0x235   : > { %v606_v34 = vpop.f32.mrf.mxu0 }
 0x236   : > { %417 = vst [vmem:[%s286_s13] sm:$0xff] %v414_v33 }
 0x237   : > { %753 = shalt.err (!%p750_p5)
}
 0x238   : > { %s754_s3 = scalar_lea.hbm %s1007_s15, 128  ;;  %s758_s28 = scalar_lea.hbm %s1054_s5, 256 }
 0x239   : > { %p755_p7 = scmp.ne.s32.totalorder %s1007_s15, %s754_s3  ;;  %p759_p9 = scmp.lt.s32.totalorder %s1007_s15, %s1054_s5 }
 0x23a   : > { %p760_p11 = scmp.lt.s32.totalorder %s758_s28, %s754_s3 }
 0x23b   : > { %p756_p6 = pnand %p755_p7, %p950_p13 }
 0x23c   : > { %p761_p12 = por %p760_p11, %p759_p9 }
 0x23d   : > { %p757_p4 = pneg %p756_p6 }
 0x23f   : > { %p762_p1 = pnand %p761_p12, %p757_p4 }
 0x241   : > { %765 = shalt.err (!%p762_p1)
}
 0x242   : > { %613 = dma.vmem_to_hbm [thread:$0]  (%p950_p13), %s434_s14, 128, %s1007_s15, %s419_s8  }
 0x243 PF: > { %s445_s11 = sand.u32 1, %s804_s18   ;;  %p1070_p8 = scmp.ne.s32.totalorder %s1061_s29, 0 }
 0x244   : > { %p1071_p10 = scmp.ge.s32.totalorder %s824_s23, 2  ;;  %s446_s12 = scalar_lea.sflag [#allocation5], %s445_s11 }
 0x246   : > { %p624_p0 = pnand %p1071_p10, %p1070_p8 }
 0x248   : > { %p625_p2 = pneg %p624_p0 }
 0x24a   : > { %799 = dma.done.wait (%p625_p2), %s446_s12, 128  }
 0x24b   : > { %801 = vsyncadd (%p625_p2), %s446_s12, 4294967168  ;;  %s22_s23 = sadd.s32 1, %s824_s23   ;;  %s1072_s17 = sld [smem:[#allocation12_spill]] }
 0x24c   : > { %p19_p3 = scmp.ge.s32.totalorder %s22_s23, 4   ;;  %s1073_s18 = smov %s808_s19 }
 0x24d   : > { %s1074_s19 = smov %s812_s20  ;;  %s1075_s20 = smov %s959_s7 }
 0x24e   : > { %s1076_s21 = smov %s820_s22  ;;  %21 = sbr.rel (!%p19_p3) target bundleno = 9 (0x9), region = 97 }
 0x251   : > { %s1077_s22 = smov %s1072_s17 }
 0x253   :  { %451 = vsyncpa [#allocation4], 1 }
 0x254   :  { %453 = vsyncpa [#allocation4 + $0x1], 1 }
 0x255   :  { %454 = vsyncpa [#allocation7], 1 }
 0x256   :  { %455 = vsyncpa [#allocation5], 1 }
 0x257   :  { %457 = vsyncpa [#allocation5 + $0x1], 1 }

</bundles_post_ra>
